<compile_context>
chip_gen: v7x
topology: tpu7x:2x2x1
jax: 0.10.0
libtpu: 0.0.40
codegen_flags: <defaults>
</compile_context>

<pallas_src>
import math

import jax
import jax.numpy as jnp
from jax.experimental import pallas as pl
from jax.experimental.pallas import tpu as pltpu


def mlp_kernel(w1_ref, b1_ref, w2_ref, b2_ref, x_ref, o_ref):
    # Shapes inside the kernel (one batch tile of TB columns):
    #   x_ref : (F, TB)   lane-dense batch tile
    #   w1_ref: (H, F)    b1_ref: (H, 1)
    #   w2_ref: (C, H)    b2_ref: (C, 1)
    #   o_ref : (C, TB)
    f = x_ref.shape[0]
    h = w1_ref.shape[0]

    x = x_ref[...]          # (F, TB)
    w1 = w1_ref[...]        # (H, F)
    w2 = w2_ref[...]        # (C, H)

    # Layer 1: VPU broadcast-MAC over the tiny contraction dim F (avoids a
    # ~99%-padded MXU pass at K=2 / M=5).  Unrolled at trace time (F=2).
    acc1 = w1[:, 0:1] * x[0:1, :]                       # (H,1)*(1,TB) -> (H,TB)
    for k in range(1, f):
        acc1 = acc1 + w1[:, k:k + 1] * x[k:k + 1, :]
    hidden = jnp.maximum(acc1 + b1_ref[...], 0.0)       # bias + ReLU, (H, TB)

    # Layer 2: same trick over H=5.
    acc2 = w2[:, 0:1] * hidden[0:1, :]                  # (C,1)*(1,TB) -> (C,TB)
    for j in range(1, h):
        acc2 = acc2 + w2[:, j:j + 1] * hidden[j:j + 1, :]
    o_ref[...] = acc2 + b2_ref[...]                     # (C, TB)


def neural_net_forward(x, w1, b1, w2, b2, *, block_batch=65536):
    """Forward pass matching PyTorch NeuralNet.

    Args:
      x : (N, F) batch-major input (PyTorch convention).
      w1: (H, F), b1: (H, 1)  -- l1.weight / l1.bias layouts.
      w2: (C, H), b2: (C, 1)  -- l2.weight / l2.bias layouts.
      block_batch: batch tile size (multiple of 128); sized well inside the
        v7x 32 MiB scoped-VMEM budget even double-buffered
        (2 * TB * (F + C) * 4B ~= 2 MiB at the default).

    Returns: (N, C) logits, identical to relu(x @ w1.T + b1.T) @ w2.T + b2.T.
    """
    n, f = x.shape
    h = w1.shape[0]
    c = w2.shape[0]

    # Feature-major so the batch dim maps to the 128-lane axis inside the
    # kernel; pad batch up to a multiple of the tile.
    x_fm = x.T                                           # (F, N)
    tb = min(block_batch, pl.cdiv(n, 128) * 128)
    tb = max(128, (tb // 128) * 128)
    n_pad = pl.cdiv(n, tb) * tb
    if n_pad != n:
        x_fm = jnp.pad(x_fm, ((0, 0), (0, n_pad - n)))

    grid = (n_pad // tb,)
    const = lambda i: (0, 0)                             # weights stay resident

    out_fm = pl.pallas_call(
        mlp_kernel,
        out_shape=jax.ShapeDtypeStruct((c, n_pad), jnp.float32),
        grid=grid,
        in_specs=[
            pl.BlockSpec((h, f), const),                 # w1
            pl.BlockSpec((h, 1), const),                 # b1
            pl.BlockSpec((c, h), const),                 # w2
            pl.BlockSpec((c, 1), const),                 # b2
            pl.BlockSpec((f, tb), lambda i: (0, i)),     # x tile (lane-dense)
        ],
        out_specs=pl.BlockSpec((c, tb), lambda i: (0, i)),
        compiler_params=pltpu.CompilerParams(
            dimension_semantics=("parallel",)),
    )(w1, b1, w2, b2, x_fm)

    return out_fm[:, :n].T                               # back to (N, C)


def init_params(key, input_size, hidden_size, num_classes):
    # PyTorch nn.Linear default init: U(-1/sqrt(fan_in), 1/sqrt(fan_in)),
    # weights stored in PyTorch (out_features, in_features) layout.
    k1, k2, k3, k4 = jax.random.split(key, 4)
    bound1 = 1.0 / math.sqrt(input_size)
    bound2 = 1.0 / math.sqrt(hidden_size)
    w1 = jax.random.uniform(k1, (hidden_size, input_size), jnp.float32,
                            minval=-bound1, maxval=bound1)
    b1 = jax.random.uniform(k2, (hidden_size, 1), jnp.float32,
                            minval=-bound1, maxval=bound1)
    w2 = jax.random.uniform(k3, (num_classes, hidden_size), jnp.float32,
                            minval=-bound2, maxval=bound2)
    b2 = jax.random.uniform(k4, (num_classes, 1), jnp.float32,
                            minval=-bound2, maxval=bound2)
    return w1, b1, w2, b2


def _reference(x, w1, b1, w2, b2):
    # Plain-JAX forward, same math as the PyTorch module.
    return jnp.maximum(x @ w1.T + b1.T, 0.0) @ w2.T + b2.T


if __name__ == "__main__":
    input_size, hidden_size, num_classes = 2, 5, 2
    key = jax.random.PRNGKey(0)
    w1, b1, w2, b2 = init_params(key, input_size, hidden_size, num_classes)

    # 1) XOR-style inputs from the reference script (single padded tile).
    x_xor = jnp.array([[0, 0], [0, 1], [1, 0], [1, 1]], dtype=jnp.float32)
    out_xor = jax.block_until_ready(neural_net_forward(x_xor, w1, b1, w2, b2))
    assert out_xor.shape == (4, num_classes)
    assert jnp.allclose(out_xor, _reference(x_xor, w1, b1, w2, b2), atol=1e-5)

    # 2) Small batched case exercising the multi-step grid + padding path
    #    (N=300, TB=128 -> grid of 3 with a partially padded last tile).
    x_big = jax.random.normal(jax.random.PRNGKey(1), (300, input_size),
                              dtype=jnp.float32)
    out_big = jax.block_until_ready(
        neural_net_forward(x_big, w1, b1, w2, b2, block_batch=128))
    assert out_big.shape == (300, num_classes)
    assert jnp.allclose(out_big, _reference(x_big, w1, b1, w2, b2), atol=1e-4)

    # TODO(synk): predict/backpropagation/train (softmax, CE loss, Adam) are
    # training-side utilities, not part of the forward pass, and are omitted.
    print("KERNEL_OK")
</pallas_src>

<mosaic_0001>
module attributes {stable_mosaic.version = 11 : i64} {
  func.func @mlp_kernel(%arg0: i32, %arg1: memref<5x2xf32, #tpu.memory_space<vmem>>, %arg2: memref<5x1xf32, #tpu.memory_space<vmem>>, %arg3: memref<2x5xf32, #tpu.memory_space<vmem>>, %arg4: memref<2x1xf32, #tpu.memory_space<vmem>>, %arg5: memref<2x128xf32, #tpu.memory_space<vmem>>, %arg6: memref<2x128xf32, #tpu.memory_space<vmem>>) attributes {dimension_semantics = [#tpu.dimension_semantics<parallel>], iteration_bounds = array<i64: 1>, scalar_prefetch = 0 : i64, scratch_operands = 0 : i64, tpu.core_type = #tpu.core_type<tc>, window_params = [{pipeline_mode = #tpu.pipeline_mode<synchronous>, transform_indices = @transform_0, window_bounds = array<i64: 5, 2>}, {pipeline_mode = #tpu.pipeline_mode<synchronous>, transform_indices = @transform_1, window_bounds = array<i64: 5, 1>}, {pipeline_mode = #tpu.pipeline_mode<synchronous>, transform_indices = @transform_2, window_bounds = array<i64: 2, 5>}, {pipeline_mode = #tpu.pipeline_mode<synchronous>, transform_indices = @transform_3, window_bounds = array<i64: 2, 1>}, {transform_indices = @transform_4, window_bounds = array<i64: 2, 128>}, {transform_indices = @transform_5, window_bounds = array<i64: 2, 128>}]} {
    %c0 = arith.constant 0 : index
    %c0_0 = arith.constant 0 : index
    %0 = vector.load %arg5[%c0, %c0_0] : memref<2x128xf32, #tpu.memory_space<vmem>>, vector<2x128xf32>
    %c0_1 = arith.constant 0 : index
    %c0_2 = arith.constant 0 : index
    %1 = vector.load %arg1[%c0_1, %c0_2] : memref<5x2xf32, #tpu.memory_space<vmem>>, vector<5x2xf32>
    %c0_3 = arith.constant 0 : index
    %c0_4 = arith.constant 0 : index
    %2 = vector.load %arg3[%c0_3, %c0_4] : memref<2x5xf32, #tpu.memory_space<vmem>>, vector<2x5xf32>
    %3 = vector.extract_strided_slice %1 {offsets = [0, 0], sizes = [5, 1], strides = [1, 1]} : vector<5x2xf32> to vector<5x1xf32>
    %4 = vector.extract_strided_slice %0 {offsets = [0, 0], sizes = [1, 128], strides = [1, 1]} : vector<2x128xf32> to vector<1x128xf32>
    %5 = vector.broadcast %3 : vector<5x1xf32> to vector<5x128xf32>
    %6 = vector.broadcast %4 : vector<1x128xf32> to vector<5x128xf32>
    %7 = arith.mulf %5, %6 : vector<5x128xf32>
    %8 = vector.extract_strided_slice %1 {offsets = [0, 1], sizes = [5, 1], strides = [1, 1]} : vector<5x2xf32> to vector<5x1xf32>
    %9 = vector.extract_strided_slice %0 {offsets = [1, 0], sizes = [1, 128], strides = [1, 1]} : vector<2x128xf32> to vector<1x128xf32>
    %10 = vector.broadcast %8 : vector<5x1xf32> to vector<5x128xf32>
    %11 = vector.broadcast %9 : vector<1x128xf32> to vector<5x128xf32>
    %12 = arith.mulf %10, %11 : vector<5x128xf32>
    %13 = arith.addf %7, %12 : vector<5x128xf32>
    %c0_5 = arith.constant 0 : index
    %c0_6 = arith.constant 0 : index
    %14 = vector.load %arg2[%c0_5, %c0_6] : memref<5x1xf32, #tpu.memory_space<vmem>>, vector<5x1xf32>
    %15 = vector.broadcast %14 : vector<5x1xf32> to vector<5x128xf32>
    %16 = arith.addf %13, %15 : vector<5x128xf32>
    %cst = arith.constant 0.000000e+00 : f32
    %17 = vector.broadcast %cst : f32 to vector<5x128xf32>
    %18 = arith.maximumf %16, %17 : vector<5x128xf32>
    %19 = vector.extract_strided_slice %2 {offsets = [0, 0], sizes = [2, 1], strides = [1, 1]} : vector<2x5xf32> to vector<2x1xf32>
    %20 = vector.extract_strided_slice %18 {offsets = [0, 0], sizes = [1, 128], strides = [1, 1]} : vector<5x128xf32> to vector<1x128xf32>
    %21 = vector.broadcast %19 : vector<2x1xf32> to vector<2x128xf32>
    %22 = vector.broadcast %20 : vector<1x128xf32> to vector<2x128xf32>
    %23 = arith.mulf %21, %22 : vector<2x128xf32>
    %24 = vector.extract_strided_slice %2 {offsets = [0, 1], sizes = [2, 1], strides = [1, 1]} : vector<2x5xf32> to vector<2x1xf32>
    %25 = vector.extract_strided_slice %18 {offsets = [1, 0], sizes = [1, 128], strides = [1, 1]} : vector<5x128xf32> to vector<1x128xf32>
    %26 = vector.broadcast %24 : vector<2x1xf32> to vector<2x128xf32>
    %27 = vector.broadcast %25 : vector<1x128xf32> to vector<2x128xf32>
    %28 = arith.mulf %26, %27 : vector<2x128xf32>
    %29 = arith.addf %23, %28 : vector<2x128xf32>
    %30 = vector.extract_strided_slice %2 {offsets = [0, 2], sizes = [2, 1], strides = [1, 1]} : vector<2x5xf32> to vector<2x1xf32>
    %31 = vector.extract_strided_slice %18 {offsets = [2, 0], sizes = [1, 128], strides = [1, 1]} : vector<5x128xf32> to vector<1x128xf32>
    %32 = vector.broadcast %30 : vector<2x1xf32> to vector<2x128xf32>
    %33 = vector.broadcast %31 : vector<1x128xf32> to vector<2x128xf32>
    %34 = arith.mulf %32, %33 : vector<2x128xf32>
    %35 = arith.addf %29, %34 : vector<2x128xf32>
    %36 = vector.extract_strided_slice %2 {offsets = [0, 3], sizes = [2, 1], strides = [1, 1]} : vector<2x5xf32> to vector<2x1xf32>
    %37 = vector.extract_strided_slice %18 {offsets = [3, 0], sizes = [1, 128], strides = [1, 1]} : vector<5x128xf32> to vector<1x128xf32>
    %38 = vector.broadcast %36 : vector<2x1xf32> to vector<2x128xf32>
    %39 = vector.broadcast %37 : vector<1x128xf32> to vector<2x128xf32>
    %40 = arith.mulf %38, %39 : vector<2x128xf32>
    %41 = arith.addf %35, %40 : vector<2x128xf32>
    %42 = vector.extract_strided_slice %2 {offsets = [0, 4], sizes = [2, 1], strides = [1, 1]} : vector<2x5xf32> to vector<2x1xf32>
    %43 = vector.extract_strided_slice %18 {offsets = [4, 0], sizes = [1, 128], strides = [1, 1]} : vector<5x128xf32> to vector<1x128xf32>
    %44 = vector.broadcast %42 : vector<2x1xf32> to vector<2x128xf32>
    %45 = vector.broadcast %43 : vector<1x128xf32> to vector<2x128xf32>
    %46 = arith.mulf %44, %45 : vector<2x128xf32>
    %47 = arith.addf %41, %46 : vector<2x128xf32>
    %c0_7 = arith.constant 0 : index
    %c0_8 = arith.constant 0 : index
    %48 = vector.load %arg4[%c0_7, %c0_8] : memref<2x1xf32, #tpu.memory_space<vmem>>, vector<2x1xf32>
    %49 = vector.broadcast %48 : vector<2x1xf32> to vector<2x128xf32>
    %50 = arith.addf %47, %49 : vector<2x128xf32>
    %c0_9 = arith.constant 0 : index
    %c0_10 = arith.constant 0 : index
    %51 = vector.load %arg6[%c0_9, %c0_10] : memref<2x128xf32, #tpu.memory_space<vmem>>, vector<2x128xf32>
    tpu.vector_store %arg6[%c0_9, %c0_10], %50 {strides = array<i32>} : memref<2x128xf32, #tpu.memory_space<vmem>>, vector<2x128xf32>,
    return
  }
  func.func @transform_0(%arg0: i32) -> (i32, i32) {
    %c0_i32 = arith.constant 0 : i32
    %c0_i32_0 = arith.constant 0 : i32
    %c0_i32_1 = arith.constant 0 : i32
    return %c0_i32, %c0_i32_0 : i32, i32
  }
  func.func @transform_1(%arg0: i32) -> (i32, i32) {
    %c0_i32 = arith.constant 0 : i32
    %c0_i32_0 = arith.constant 0 : i32
    %c0_i32_1 = arith.constant 0 : i32
    return %c0_i32, %c0_i32_0 : i32, i32
  }
  func.func @transform_2(%arg0: i32) -> (i32, i32) {
    %c0_i32 = arith.constant 0 : i32
    %c0_i32_0 = arith.constant 0 : i32
    %c0_i32_1 = arith.constant 0 : i32
    return %c0_i32, %c0_i32_0 : i32, i32
  }
  func.func @transform_3(%arg0: i32) -> (i32, i32) {
    %c0_i32 = arith.constant 0 : i32
    %c0_i32_0 = arith.constant 0 : i32
    %c0_i32_1 = arith.constant 0 : i32
    return %c0_i32, %c0_i32_0 : i32, i32
  }
  func.func @transform_4(%arg0: i32) -> (i32, i32) {
    %c0_i32 = arith.constant 0 : i32
    %c0_i32_0 = arith.constant 0 : i32
    return %c0_i32, %arg0 : i32, i32
  }
  func.func @transform_5(%arg0: i32) -> (i32, i32) {
    %c0_i32 = arith.constant 0 : i32
    %c0_i32_0 = arith.constant 0 : i32
    return %c0_i32, %arg0 : i32, i32
  }
}

</mosaic_0001>

<bundles_post_ra>
// kernel: tpu_custom_call.1
= control target key start
LH: loop header
LB: loop body
LE: loop exit
PB: predicated region body
PF: predicated region fallthrough
CT: control target
= control target key end

     0   :  { %v162_v2 = vmov 0   ;;  %s225_s0 = inlined_call_operand.vmem [shape: f32[5,2], index: 0, kind: input, shape index: {}]   ;;  %s226_s1 = inlined_call_operand.vmem [shape: f32[5,1], index: 1, kind: input, shape index: {}]   ;;  %s227_s2 = inlined_call_operand.vmem [shape: f32[2,5], index: 2, kind: input, shape index: {}]   ;;  %s228_s3 = inlined_call_operand.vmem [shape: f32[2,1], index: 3, kind: input, shape index: {}]   ;;  %s229_s4 = inlined_call_operand.vmem [shape: f32[2,128], index: 4, kind: input, shape index: {}]   ;;  %s230_s5 = inlined_call_operand.hbm [shape: f32[2,128], index: 5, kind: output, shape index: {}]  }
   0x1   :  { %v44_v0 = vld [vmem:[%s226_s1] sm:$0x1f]  ;;  %132 = vset.pattern.permute.xlu1 %v162_v2  ;;  %130 = vset.pattern.permute.xlu0 %v162_v2 }
   0x2   :  { %v22_v1 = vld [vmem:[%s225_s0] sm:$0x1f]  ;;  %47 = vperm.xlu1 %132, %v44_v0  }
   0x3   :  { %26 = vperm.xlu0 %130, %v22_v1   ;;  %v23_v3 = vld [vmem:[%s227_s2] sm:$0x3] }
   0x4   :  { %10 = vsyncpa [#allocation3], 0  ;;  %v163_v4 = vmov 1   ;;  %v164_v5 = vmov 2   ;;  %v102_v6 = vld [vmem:[%s228_s3] sm:$0x3]  ;;  %v29_v9 = vlaneseq }
   0x5   :  { %v165_v7 = vmov 3   ;;  %v166_v8 = vmov 4   ;;  %v21_v13 = vld [vmem:[%s229_s4] sm:$0x3]  ;;  %s167_s3 = smov [#allocation2]  }
   0x6   :  { %54 = vperm.xlu1 %132, %v23_v3   ;;  %v30_v10 = vshrl.u32 %v29_v9, 7  ;;  %s116_s4 = sshll.u32 %s167_s3, 4  ;;  %s117_s4 = int_to_ptr.vmem [resolvable:$true] %s116_s4 }
   0x7   :  { %131 = vset.pattern.permute.xlu0 %v163_v4  ;;  %s138_s25 = scalar_lea.vmem %s117_s4, 32  ;;  %p143_p1 = scmp.lt.s32.totalorder %s117_s4, %s117_s4 }
   0x8   :  { %35 = vperm.xlu0 %131, %v22_v1   ;;  %v31_v11 = vsub.s32 0, %v30_v10  ;;  %v40_v12 = vsub.s32 1, %v30_v10  ;;  %v78_v25 = vsub.s32 2, %v30_v10  ;;  %v88_v27 = vsub.s32 3, %v30_v10  ;;  %p139_p0 = scmp.ne.s32.totalorder %s117_s4, %s138_s25  ;;  %p144_p2 = scmp.lt.s32.totalorder %s138_s25, %s138_s25 }
   0x9   :  { %v98_v36 = vsub.s32 4, %v30_v10 }
   0xa   :  { %133 = vset.pattern.permute.xlu1 %v163_v4  ;;  %v32_v16 = vrot.slane %v21_v13, %v31_v11  ;;  %v41_v17 = vrot.slane %v21_v13, %v40_v12  ;;  %p145_p3 = por %p144_p2, %p143_p1 }
   0xb   :  { %63 = vperm.xlu1 %133, %v23_v3  }
   0xc   :  { %134 = vset.pattern.permute.xlu0 %v164_v5  ;;  %p146_p4 = pnand %p145_p3, %p139_p0 }
   0xd   :  { %73 = vperm.xlu0 %134, %v23_v3  }
   0xf   :  { %135 = vset.pattern.permute.xlu1 %v165_v7 }
  0x10   :  { %83 = vperm.xlu1 %135, %v23_v3  }
  0x11   :  { %137 = vset.pattern.permute.xlu0 %v162_v2 }
  0x12   :  { %105 = vperm.xlu0 %137, %v102_v6  }
  0x14   :  { %136 = vset.pattern.permute.xlu1 %v166_v8 }
  0x15   :  { %93 = vperm.xlu1 %136, %v23_v3  }
  0x81   :  { %v48_v14 = vpop.permute.xlu1 %47 }
  0x82   :  { %v27_v15 = vpop.permute.xlu0 %26 }
  0x83   :  { %v33_v20 = vmul.f32 %v32_v16, %v27_v15 }
  0x85   :  { %v55_v18 = vpop.permute.xlu1 %54 }
  0x87   :  { %v36_v19 = vpop.permute.xlu0 %35 }
  0x88   :  { %v42_v21 = vmul.f32 %v41_v17, %v36_v19 }
  0x8a   :  { %v43_v22 = vadd.f32 %v42_v21, %v33_v20  ;;  %v64_v23 = vpop.permute.xlu1 %63 }
  0x8c   :  { %v50_v24 = vadd.f32 %v48_v14, %v43_v22  ;;  %v74_v32 = vpop.permute.xlu0 %73 }
  0x8e   :  { %v51_v26 = vmax.f32 %v50_v24, 0.0 }
  0x8f   :  { %v84_v30 = vpop.permute.xlu1 %83 }
  0x90   :  { %v60_v28 = vrot.slane %v51_v26, %v31_v11  ;;  %v69_v29 = vrot.slane %v51_v26, %v40_v12  ;;  %v79_v31 = vrot.slane %v51_v26, %v78_v25  ;;  %v89_v35 = vrot.slane %v51_v26, %v88_v27 }
  0x91   :  { %v99_v42 = vrot.slane %v51_v26, %v98_v36  ;;  %v106_v45 = vpop.permute.xlu0 %105 }
  0x92   :  { %v61_v33 = vmul.f32 %v60_v28, %v55_v18  ;;  %v70_v34 = vmul.f32 %v69_v29, %v64_v23  ;;  %v80_v38 = vmul.f32 %v79_v31, %v74_v32  ;;  %v90_v40 = vmul.f32 %v89_v35, %v84_v30 }
  0x94   :  { %v71_v37 = vadd.f32 %v70_v34, %v61_v33  ;;  %v94_v39 = vpop.permute.xlu1 %93 }
  0x95   :  { %v100_v43 = vmul.f32 %v99_v42, %v94_v39 }
  0x96   :  { %v81_v41 = vadd.f32 %v80_v38, %v71_v37 }
  0x98   :  { %v91_v44 = vadd.f32 %v90_v40, %v81_v41 }
  0x9a   :  { %v101_v46 = vadd.f32 %v100_v43, %v91_v44 }
  0x9c   :  { %v108_v47 = vadd.f32 %v106_v45, %v101_v46 }
  0x9e   :  { %109 = vst [vmem:[#allocation2] sm:$0x3] %v108_v47 }
  0x9f   :  { %149 = shalt.err (!%p146_p4)
}
  0xa0   :  { %s150_s28 = scalar_lea.hbm %s230_s5, 32 }
  0xa1   :  { %p151_p5 = scmp.ne.s32.totalorder %s230_s5, %s150_s28  ;;  %p154_p6 = scmp.lt.u32.totalorder %s150_s28, %s230_s5 }
  0xa3   :  { %p156_p7 = pnand %p154_p6, %p151_p5 }
  0xa5   :  { %159 = shalt.err (!%p156_p7)
}
  0xa6   :  { %119 = dma.vmem_to_hbm [thread:$0]  %s117_s4, 32, %s230_s5, [#allocation3]  }
  0xa7   :  { %160 = dma.done.wait [#allocation3], 32  }
  0xa8   :  { %161 = vsyncadd [#allocation3], 4294967264 }
  0xa9   :  { %123 = vsyncpa [#allocation3], 1 }

</bundles_post_ra>
